<compile_context>
chip_gen: v7x
topology: tpu7x:2x2x1
jax: 0.10.0
libtpu: 0.0.40
codegen_flags: <defaults>
</compile_context>

<pallas_src>
import functools

import jax
import jax.numpy as jnp
from jax import lax
from jax.experimental import pallas as pl
from jax.experimental.pallas import tpu as pltpu


def _pick_block(n):
    """Samples per grid step.

    Batch samples to amortize the ~0.35 us per-grid-step overhead and give the
    pipeline real DMA to overlap, but keep at least two grid steps when N > 1
    so both v7x TensorCores can be used (v5e/v6e have a single TC).
    """
    best = 1
    for b in range(1, min(n, 8) + 1):
        if n % b == 0 and (n // b >= 2 or n == 1):
            best = b
    return best


def _down_block_kernel(pat_ref, w_ref, aff_ref, o_ref, *, hf, wf):
    """Fused DownBlock for one block of samples (lane-dense layout).

    pat_ref : (B, 9*Cin, 4*Hf*Wf) bf16  transposed im2col patches.  Columns are
              ordered (a, b, p, q) with conv-output pixel (r, s) = (2p+a, 2q+b),
              so the four stride-2 "phases" of the conv output are contiguous
              lane blocks of width Hf*Wf each.
    w_ref   : (Cout, 9*Cin)       bf16  conv weight, K ordered (dy, dx, cin).
    aff_ref : (Cout, 2)           f32   col 0: BN scale, col 1: folded shift
                                        (conv bias + BN mean/beta).
    o_ref   : (B, Cout, Hf*Wf)    f32   pooled / normalized / ReLU'd output,
                                        byte-identical to NCHW.
    """
    blk = pat_ref.shape[0]
    cout = w_ref.shape[0]
    hw = hf * wf
    neg = jnp.float32(-jnp.inf)

    # ---- hoisted once per grid step (not per sample / per row) ---------------
    w = w_ref[...]                                   # (Cout, 9*Cin) bf16
    scale = aff_ref[:, 0:1]                          # (Cout, 1) f32
    shift = aff_ref[:, 1:2]                          # (Cout, 1) f32
    lam = lax.broadcasted_iota(jnp.int32, (cout, hw), 1)
    q_ge_1 = (lam % wf) >= 1                         # pool column q >= 1

    def shifted(x, k):
        # result[:, t] = x[:, t - k] for t >= k, else -inf (whole-slab slice+concat)
        k = min(k, hw)
        pad = jnp.full((cout, k), neg, jnp.float32)
        return jnp.concatenate([pad, x[:, :hw - k]], axis=1)

    for b in range(blk):                             # static unroll, blk is small
        # ---- conv: one lane-dense MXU matmul, f32 accumulation ---------------
        conv = jnp.dot(w, pat_ref[b],
                       preferred_element_type=jnp.float32)   # (Cout, 4*Hf*Wf)

        # ---- maxpool 3x3 / stride 2 / pad 1, fully vectorized -----------------
        # Phase (a, b) of the conv output is lane block a*2 + b.  The 9 window
        # taps of pool pixel (p, q) are the 4 phases at (p, q) plus 5 shifted
        # copies; out-of-window positions are filled with -inf.
        p00 = conv[:, 0 * hw:1 * hw]                 # conv(2p  , 2q  )
        p01 = conv[:, 1 * hw:2 * hw]                 # conv(2p  , 2q+1)
        p10 = conv[:, 2 * hw:3 * hw]                 # conv(2p+1, 2q  )
        p11 = conv[:, 3 * hw:4 * hw]                 # conv(2p+1, 2q+1)
        cand = [
            p00, p01, p10, p11,
            jnp.where(q_ge_1, shifted(p01, 1), neg),       # conv(2p  , 2q-1)
            jnp.where(q_ge_1, shifted(p11, 1), neg),       # conv(2p+1, 2q-1)
            shifted(p10, wf),                              # conv(2p-1, 2q  )
            shifted(p11, wf),                              # conv(2p-1, 2q+1)
            jnp.where(q_ge_1, shifted(p11, wf + 1), neg),  # conv(2p-1, 2q-1)
        ]
        pooled = functools.reduce(jnp.maximum, cand)       # (Cout, Hf*Wf) f32

        # ---- BN(inference) affine (conv bias folded in) + ReLU, one epilogue --
        y = jnp.maximum(pooled * scale + shift, 0.0)
        o_ref[b] = y.astype(o_ref.dtype)                   # single lane-dense store


def down_block(x_nchw, weight, bias, gamma, beta, running_mean, running_var,
               eps=1e-5):
    """Forward of DownBlock: ReLU(BN(MaxPool(Conv(x)))).

    x_nchw: (N, Cin, H, W) f32; weight: (Cout, Cin, 3, 3); bias/gamma/beta/
    running_mean/running_var: (Cout,).  Returns (N, Cout, Hf, Wf) f32.
    """
    N, Cin, H, W = x_nchw.shape
    Cout = weight.shape[0]
    KH = KW = 3
    Ho = (H - 1) // 2 + 1          # conv k3 s2 p1
    Wo = (W - 1) // 2 + 1
    Hf = (Ho - 1) // 2 + 1         # pool k3 s2 p1
    Wf = (Wo - 1) // 2 + 1
    assert Ho == 2 * Hf and Wo == 2 * Wf, (
        "kernel currently requires even conv-output dims (see TODO)")
    HW = Hf * Wf
    S4 = 4 * HW                    # == Ho * Wo

    # ---- wrapper glue: one fused XLA pass, ~1.1x the f32 input bytes in bf16 --
    # Transposed im2col with contraction dim on sublanes and conv-output pixels
    # on lanes, pixel order phase-major (a, b, p, q) so the kernel's pooling is
    # pure whole-slab shifts (no in-kernel gather/relayout).
    xpad = jnp.pad(x_nchw, ((0, 0), (0, 0), (1, 1), (1, 1)))
    taps = [xpad[:, :, dy:dy + 2 * Ho:2, dx:dx + 2 * Wo:2]       # (N, Cin, Ho, Wo)
            for dy in range(KH) for dx in range(KW)]
    pat = jnp.stack(taps, axis=1)                                # (N, 9, Cin, Ho, Wo)
    pat = pat.reshape(N, KH * KW, Cin, Hf, 2, Wf, 2)             # r=(p,a), s=(q,b)
    pat = pat.transpose(0, 1, 2, 4, 6, 3, 5)                     # (N, 9, Cin, a, b, p, q)
    pat = pat.reshape(N, KH * KW * Cin, S4).astype(jnp.bfloat16)

    # weight (Cout, Cin, kh, kw) -> (Cout, kh, kw, cin) -> (Cout, 9*Cin), bf16
    w2 = weight.transpose(0, 2, 3, 1).reshape(Cout, KH * KW * Cin)
    w2 = w2.astype(jnp.bfloat16)

    # BatchNorm (inference) folded with the conv bias into one per-channel affine
    # applied after pooling: out = pool(conv_nobias)*scale + (bias-mean)*scale + beta.
    scale = gamma / jnp.sqrt(running_var + eps)
    shift = (bias - running_mean) * scale + beta
    aff = jnp.stack([scale, shift], axis=1).astype(jnp.float32)  # (Cout, 2)

    blk = _pick_block(N)
    grid = (N // blk,)

    kernel = functools.partial(_down_block_kernel, hf=Hf, wf=Wf)
    flops = 2 * N * Cout * (KH * KW * Cin) * (Ho * Wo)
    bytes_accessed = (pat.size * 2 + w2.size * 2 + aff.size * 4
                      + N * Cout * HW * 4)

    out = pl.pallas_call(
        kernel,
        out_shape=jax.ShapeDtypeStruct((N, Cout, HW), jnp.float32),
        grid=grid,
        in_specs=[
            pl.BlockSpec((blk, KH * KW * Cin, S4), lambda g: (g, 0, 0)),  # patches
            pl.BlockSpec((Cout, KH * KW * Cin), lambda g: (0, 0)),        # weight
            pl.BlockSpec((Cout, 2), lambda g: (0, 0)),                    # BN affine
        ],
        out_specs=pl.BlockSpec((blk, Cout, HW), lambda g: (g, 0, 0)),
        compiler_params=pltpu.CompilerParams(
            dimension_semantics=("parallel",)),
        cost_estimate=pl.CostEstimate(flops=flops, transcendentals=0,
                                      bytes_accessed=bytes_accessed),
    )(pat, w2, aff)

    # (N, Cout, Hf*Wf) is byte-identical to NCHW: metadata-only reshape, no
    # transpose pass over HBM.
    return out.reshape(N, Cout, Hf, Wf)


def _reference(x, weight, bias, gamma, beta, mean, var, eps):
    # Inputs rounded through bf16 to match the kernel's MXU operand precision.
    xb = x.astype(jnp.bfloat16).astype(jnp.float32)
    wb = weight.astype(jnp.bfloat16).astype(jnp.float32)
    y = lax.conv_general_dilated(
        xb, wb, window_strides=(2, 2), padding=((1, 1), (1, 1)),
        dimension_numbers=("NCHW", "OIHW", "NCHW"),
        preferred_element_type=jnp.float32)
    y = y + bias.reshape(1, -1, 1, 1)
    y = lax.reduce_window(y, -jnp.inf, lax.max,
                          window_dimensions=(1, 1, 3, 3),
                          window_strides=(1, 1, 2, 2),
                          padding=((0, 0), (0, 0), (1, 1), (1, 1)))
    s = (gamma / jnp.sqrt(var + eps)).reshape(1, -1, 1, 1)
    y = (y - mean.reshape(1, -1, 1, 1)) * s + beta.reshape(1, -1, 1, 1)
    return jnp.maximum(y, 0.0)


if __name__ == "__main__":
    key = jax.random.PRNGKey(0)
    kx, kw, kb, kg, kbe, km, kv = jax.random.split(key, 7)

    N, Cin, H, W = 2, 4, 16, 16
    Cout = 8
    eps = 1e-5

    x = jax.random.normal(kx, (N, Cin, H, W), dtype=jnp.float32)
    fan_in = Cin * 3 * 3
    weight = jax.random.normal(kw, (Cout, Cin, 3, 3), dtype=jnp.float32) / jnp.sqrt(fan_in)
    bias = 0.1 * jax.random.normal(kb, (Cout,), dtype=jnp.float32)
    gamma = 1.0 + 0.1 * jax.random.normal(kg, (Cout,), dtype=jnp.float32)
    beta = 0.1 * jax.random.normal(kbe, (Cout,), dtype=jnp.float32)
    r_mean = 0.05 * jax.random.normal(km, (Cout,), dtype=jnp.float32)
    r_var = 0.5 + jnp.abs(jax.random.normal(kv, (Cout,), dtype=jnp.float32))

    out = jax.jit(down_block)(x, weight, bias, gamma, beta, r_mean, r_var)
    out = jax.block_until_ready(out)

    ref = _reference(x, weight, bias, gamma, beta, r_mean, r_var, eps)
    assert out.shape == ref.shape, (out.shape, ref.shape)
    max_err = float(jnp.max(jnp.abs(out - ref)))
    if max_err > 1e-3:
        raise AssertionError(f"Pallas kernel mismatch vs reference: max_err={max_err}")

    print("KERNEL_OK")
</pallas_src>

<mosaic_0001>
module attributes {stable_mosaic.version = 11 : i64} {
  func.func @_down_block_kernel(%arg0: i32, %arg1: memref<1x36x64xbf16, #tpu.memory_space<vmem>>, %arg2: memref<8x36xbf16, #tpu.memory_space<vmem>>, %arg3: memref<8x2xf32, #tpu.memory_space<vmem>>, %arg4: memref<1x8x16xf32, #tpu.memory_space<vmem>>) attributes {dimension_semantics = [#tpu.dimension_semantics<parallel>], iteration_bounds = array<i64: 2>, scalar_prefetch = 0 : i64, scratch_operands = 0 : i64, tpu.core_type = #tpu.core_type<tc>, window_params = [{transform_indices = @transform_0, window_bounds = array<i64: 1, 36, 64>}, {pipeline_mode = #tpu.pipeline_mode<synchronous>, transform_indices = @transform_1, window_bounds = array<i64: 8, 36>}, {pipeline_mode = #tpu.pipeline_mode<synchronous>, transform_indices = @transform_2, window_bounds = array<i64: 8, 2>}, {transform_indices = @transform_3, window_bounds = array<i64: 1, 8, 16>}]} {
    %c0 = arith.constant 0 : index
    %c0_0 = arith.constant 0 : index
    %0 = vector.load %arg2[%c0, %c0_0] : memref<8x36xbf16, #tpu.memory_space<vmem>>, vector<8x36xbf16>
    %c0_1 = arith.constant 0 : index
    %c0_2 = arith.constant 0 : index
    %1 = vector.load %arg3[%c0_1, %c0_2] : memref<8x2xf32, #tpu.memory_space<vmem>>, vector<8x1xf32>
    %c0_3 = arith.constant 0 : index
    %c1 = arith.constant 1 : index
    %2 = vector.load %arg3[%c0_3, %c1] : memref<8x2xf32, #tpu.memory_space<vmem>>, vector<8x1xf32>
    %3 = tpu.iota {dimensions = array<i32: 1>} : vector<8x16xi32>
    %c4_i32 = arith.constant 4 : i32
    %c0_i32 = arith.constant 0 : i32
    %4 = arith.cmpi eq, %c4_i32, %c0_i32 : i32
    %c1_i32 = arith.constant 1 : i32
    %5 = arith.select %4, %c1_i32, %c4_i32 : i32
    %6 = vector.broadcast %5 : i32 to vector<8x16xi32>
    %7 = arith.remsi %3, %6 : vector<8x16xi32>
    %c0_i32_4 = arith.constant 0 : i32
    %8 = vector.broadcast %c0_i32_4 : i32 to vector<8x16xi32>
    %9 = arith.cmpi ne, %7, %8 : vector<8x16xi32>
    %c0_i32_5 = arith.constant 0 : i32
    %10 = vector.broadcast %c0_i32_5 : i32 to vector<8x16xi32>
    %11 = arith.cmpi slt, %7, %10 : vector<8x16xi32>
    %c0_i32_6 = arith.constant 0 : i32
    %12 = arith.cmpi slt, %5, %c0_i32_6 : i32
    %13 = vector.broadcast %12 : i1 to vector<8x16xi1>
    %14 = vector.broadcast %13 : vector<8x16xi1> to vector<8x16xi1>
    %15 = arith.xori %11, %14 : vector<8x16xi1>
    %16 = arith.andi %15, %9 : vector<8x16xi1>
    %17 = vector.broadcast %5 : i32 to vector<8x16xi32>
    %18 = arith.addi %7, %17 : vector<8x16xi32>
    %19 = arith.select %16, %18, %7 : vector<8x16xi1>, vector<8x16xi32>
    %c1_i32_7 = arith.constant 1 : i32
    %20 = vector.broadcast %c1_i32_7 : i32 to vector<8x16xi32>
    %21 = arith.cmpi sge, %19, %20 : vector<8x16xi32>
    %c0_8 = arith.constant 0 : index
    %c0_9 = arith.constant 0 : index
    %c0_10 = arith.constant 0 : index
    %22 = vector.load %arg1[%c0_8, %c0_9, %c0_10] : memref<1x36x64xbf16, #tpu.memory_space<vmem>>, vector<1x36x64xbf16>
    %23 = vector.shape_cast %22 : vector<1x36x64xbf16> to vector<36x64xbf16>
    %cst = arith.constant dense<0.000000e+00> : vector<8x64xf32>
    %24 = tpu.matmul %0, %23, %cst {dimension_numbers = #tpu.dot_dimension_numbers<[1], [0], [0], [1], [0, 0, 1, 1], [], []>} : vector<8x36xbf16>, vector<36x64xbf16>, vector<8x64xf32> -> vector<8x64xf32>
    %25 = vector.extract_strided_slice %24 {offsets = [0, 0], sizes = [8, 16], strides = [1, 1]} : vector<8x64xf32> to vector<8x16xf32>
    %26 = vector.extract_strided_slice %24 {offsets = [0, 16], sizes = [8, 16], strides = [1, 1]} : vector<8x64xf32> to vector<8x16xf32>
    %27 = vector.extract_strided_slice %24 {offsets = [0, 32], sizes = [8, 16], strides = [1, 1]} : vector<8x64xf32> to vector<8x16xf32>
    %28 = vector.extract_strided_slice %24 {offsets = [0, 48], sizes = [8, 16], strides = [1, 1]} : vector<8x64xf32> to vector<8x16xf32>
    %cst_11 = arith.constant 0xFF800000 : f32
    %29 = vector.broadcast %cst_11 : f32 to vector<8x1xf32>
    %30 = vector.extract_strided_slice %26 {offsets = [0, 0], sizes = [8, 15], strides = [1, 1]} : vector<8x16xf32> to vector<8x15xf32>
    %31 = tpu.concatenate %29, %30 in 1 : vector<8x1xf32>, vector<8x15xf32> -> vector<8x16xf32>
    %cst_12 = arith.constant 0xFF800000 : f32
    %32 = vector.broadcast %cst_12 : f32 to vector<8x16xf32>
    %33 = arith.select %21, %31, %32 : vector<8x16xi1>, vector<8x16xf32>
    %cst_13 = arith.constant 0xFF800000 : f32
    %34 = vector.broadcast %cst_13 : f32 to vector<8x1xf32>
    %35 = vector.extract_strided_slice %28 {offsets = [0, 0], sizes = [8, 15], strides = [1, 1]} : vector<8x16xf32> to vector<8x15xf32>
    %36 = tpu.concatenate %34, %35 in 1 : vector<8x1xf32>, vector<8x15xf32> -> vector<8x16xf32>
    %cst_14 = arith.constant 0xFF800000 : f32
    %37 = vector.broadcast %cst_14 : f32 to vector<8x16xf32>
    %38 = arith.select %21, %36, %37 : vector<8x16xi1>, vector<8x16xf32>
    %cst_15 = arith.constant 0xFF800000 : f32
    %39 = vector.broadcast %cst_15 : f32 to vector<8x4xf32>
    %40 = vector.extract_strided_slice %27 {offsets = [0, 0], sizes = [8, 12], strides = [1, 1]} : vector<8x16xf32> to vector<8x12xf32>
    %41 = tpu.concatenate %39, %40 in 1 : vector<8x4xf32>, vector<8x12xf32> -> vector<8x16xf32>
    %cst_16 = arith.constant 0xFF800000 : f32
    %42 = vector.broadcast %cst_16 : f32 to vector<8x4xf32>
    %43 = vector.extract_strided_slice %28 {offsets = [0, 0], sizes = [8, 12], strides = [1, 1]} : vector<8x16xf32> to vector<8x12xf32>
    %44 = tpu.concatenate %42, %43 in 1 : vector<8x4xf32>, vector<8x12xf32> -> vector<8x16xf32>
    %cst_17 = arith.constant 0xFF800000 : f32
    %45 = vector.broadcast %cst_17 : f32 to vector<8x5xf32>
    %46 = vector.extract_strided_slice %28 {offsets = [0, 0], sizes = [8, 11], strides = [1, 1]} : vector<8x16xf32> to vector<8x11xf32>
    %47 = tpu.concatenate %45, %46 in 1 : vector<8x5xf32>, vector<8x11xf32> -> vector<8x16xf32>
    %cst_18 = arith.constant 0xFF800000 : f32
    %48 = vector.broadcast %cst_18 : f32 to vector<8x16xf32>
    %49 = arith.select %21, %47, %48 : vector<8x16xi1>, vector<8x16xf32>
    %50 = arith.maximumf %25, %26 : vector<8x16xf32>
    %51 = arith.maximumf %50, %27 : vector<8x16xf32>
    %52 = arith.maximumf %51, %28 : vector<8x16xf32>
    %53 = arith.maximumf %52, %33 : vector<8x16xf32>
    %54 = arith.maximumf %53, %38 : vector<8x16xf32>
    %55 = arith.maximumf %54, %41 : vector<8x16xf32>
    %56 = arith.maximumf %55, %44 : vector<8x16xf32>
    %57 = arith.maximumf %56, %49 : vector<8x16xf32>
    %58 = vector.broadcast %1 : vector<8x1xf32> to vector<8x16xf32>
    %59 = arith.mulf %57, %58 : vector<8x16xf32>
    %60 = vector.broadcast %2 : vector<8x1xf32> to vector<8x16xf32>
    %61 = arith.addf %59, %60 : vector<8x16xf32>
    %cst_19 = arith.constant 0.000000e+00 : f32
    %62 = vector.broadcast %cst_19 : f32 to vector<8x16xf32>
    %63 = arith.maximumf %61, %62 : vector<8x16xf32>
    %c0_20 = arith.constant 0 : index
    %c0_21 = arith.constant 0 : index
    %c0_22 = arith.constant 0 : index
    %64 = vector.load %arg4[%c0_20, %c0_21, %c0_22] : memref<1x8x16xf32, #tpu.memory_space<vmem>>, vector<1x8x16xf32>
    %65 = vector.shape_cast %64 : vector<1x8x16xf32> to vector<8x16xf32>
    %66 = vector.shape_cast %63 : vector<8x16xf32> to vector<1x8x16xf32>
    tpu.vector_store %arg4[%c0_20, %c0_21, %c0_22], %66 {strides = array<i32>} : memref<1x8x16xf32, #tpu.memory_space<vmem>>, vector<1x8x16xf32>,
    return
  }
  func.func @transform_0(%arg0: i32) -> (i32, i32, i32) {
    %c0_i32 = arith.constant 0 : i32
    %c0_i32_0 = arith.constant 0 : i32
    %c0_i32_1 = arith.constant 0 : i32
    return %arg0, %c0_i32, %c0_i32_0 : i32, i32, i32
  }
  func.func @transform_1(%arg0: i32) -> (i32, i32) {
    %c0_i32 = arith.constant 0 : i32
    %c0_i32_0 = arith.constant 0 : i32
    %c0_i32_1 = arith.constant 0 : i32
    return %c0_i32, %c0_i32_0 : i32, i32
  }
  func.func @transform_2(%arg0: i32) -> (i32, i32) {
    %c0_i32 = arith.constant 0 : i32
    %c0_i32_0 = arith.constant 0 : i32
    %c0_i32_1 = arith.constant 0 : i32
    return %c0_i32, %c0_i32_0 : i32, i32
  }
  func.func @transform_3(%arg0: i32) -> (i32, i32, i32) {
    %c0_i32 = arith.constant 0 : i32
    %c0_i32_0 = arith.constant 0 : i32
    %c0_i32_1 = arith.constant 0 : i32
    return %arg0, %c0_i32, %c0_i32_0 : i32, i32, i32
  }
}

</mosaic_0001>

<bundles_post_ra>
// kernel: down_block.1
= control target key start
LH: loop header
LB: loop body
LE: loop exit
PB: predicated region body
PF: predicated region fallthrough
CT: control target
= control target key end

     0   :  { %s460_s12 = smov 0   ;;  %s497_s0 = inlined_call_operand.vmem [shape: bf16[2,36,64], index: 0, kind: input, shape index: {}]   ;;  %s498_s1 = inlined_call_operand.vmem [shape: bf16[8,36], index: 1, kind: input, shape index: {}]   ;;  %s499_s2 = inlined_call_operand.vmem [shape: f32[8,2], index: 2, kind: input, shape index: {}]   ;;  %s500_s3 = inlined_call_operand.vmem [shape: f32[2,8,16], index: 3, kind: output, shape index: {}]  }
   0x1 LB: > { %s366_s13 = sadd.s32 4294967295, %s426_s12   ;;  %p370_p0 = scmp.ge.s32.totalorder %s426_s12, 1  ;;  %s426_s12 = sphi %s460_s12, %s13_s12  }
   0x2   : > { %p137_p1 = scmp.lt.s32.totalorder %s426_s12, 3 }
   0x4   : > { %p138_p2 = pnand %p370_p0, %p137_p1 }
   0x5   : > { %p160_p3 = scmp.lt.s32.totalorder (!%p138_p2), %s366_s13, 1  ;;  %v428_v0 = vmov (!%p138_p2), 0.0   ;;  %vm429_vm0 = vmmov (!%p138_p2), 0   ;;  %vm211_vm1 = vcmask (!%p138_p2), 1041408   ;;  %v170_v5 = vld [vmem:[%s498_s1] sm:$0xf] (!%p138_p2)  ;;  %v172_v14 = vlaneseq (!%p138_p2) }
   0x6   : > { %141 = sbr.rel (%p138_p2) target bundleno = 396 (0x18c), region = 32  ;;  %383 = vmatprep.subr.bf16.mxu0 (!%p138_p2), %v428_v0  ;;  %389 = vmatprep.mubr.msk.bf16.mxu0 (!%p138_p2), %vm429_vm0, %v428_v0  ;;  %vm207_vm2 = vcmask (!%p138_p2), 293888   ;;  %v430_v6 = vmov (!%p138_p2), 0   ;;  %v431_v7 = vmov (!%p138_p2), 1   ;;  %s432_s20 = smov (!%p138_p2), 113   ;;  %v171_v12 = vld [vmem:[%s499_s2] sm:$0xff] (!%p138_p2) }
   0x7   : > { %414 = vset.pattern.permute.xlu0 (!%p138_p2), %v430_v6  ;;  %415 = vset.pattern.permute.xlu1 (!%p138_p2), %v431_v7  ;;  %s433_s21 = smov (!%p138_p2), 112   ;;  %s434_s22 = smov (!%p138_p2), 80   ;;  %v173_v15 = vand.u32 (!%p138_p2), 127, %v172_v14  ;;  %vm259_vm3 = vcmask (!%p138_p2), 7168   ;;  %vm270_vm5 = vcmask (!%p138_p2), 31744   ;;  %vm279_vm6 = vcmask (!%p138_p2), 39936  }
   0x8   : > { %s435_s23 = smov (!%p138_p2), 96   ;;  %s436_s24 = smov (!%p138_p2), 100   ;;  %vm311_vm7 = vcmask (!%p138_p2), 130048  }
   0x9   : > { %s437_s25 = smov (!%p138_p2), 81   ;;  %s438_s28 = smov (!%p138_p2), 84   ;;  %v178_v19 = vand.u32 (!%p138_p2), 3, %v173_v15 }
   0xa   : > { %s439_s29 = smov (!%p138_p2), 85  }
   0xb   : > { %vm480_vm4 = vcmp.ge.s32.totalorder (!%p138_p2), %v178_v19, 1 }
   0xd   : > { %s504_s13 = smov (!%p160_p3, %s366_s13), 1 }
   0xe   : > { %s393_s14 = smul.u32 20, %s504_s13  ;;  %s372_s30 = sshll.u32 %s504_s13, 3 }
   0xf   : > { %s168_s6 = scalar_lea.vmem %s500_s3, %s372_s30 }
  0x10   : > { %s164_s17 = scalar_lea.vmem %s497_s0, %s393_s14 }
  0x11   : > { %v417_v1 = vld [vmem:[%s164_s17] sm:$0xff]   ;;  %v418_v2 = vld [vmem:[%s164_s17 + $0x8] sm:$0xff]   ;;  %v419_v3 = vld [vmem:[%s164_s17 + $0x10] ss:$0 sps:$4 sm:$0x33]  }
  0x12   : > { %384 = vmatpush3.bf16.msra.mxu0 %v417_v1  ;;  %v213_v4 = vsel %vm211_vm1, %v419_v3, 0 }
  0x13   : > { %385 = vmatprep.subr.bf16.mxu0 %v428_v0 }
  0x16   : > { %386 = vmatpush3.bf16.msra.mxu0 %v418_v2 }
  0x17   : > { %387 = vmatprep.subr.bf16.mxu0 %v428_v0 }
  0x1a   : > { %388 = vmatpush3.bf16.msra.mxu0 %v213_v4 }
  0x1d   : > { %390 = vmatmul.mubr.msk.bf16.vlgmr.msra.gmra.mrb[0].mxu0 %vm207_vm2, %v170_v5 }
  0xf0   : > { %v249_v8 = vpop.f32.mrb[0].mxu0 }
  0xf1   : > { %256 = vrot.lane.b32.xlu1 %v249_v8, %s432_s20  ;;  %282 = vrot.lane.b32.xlu0 %v249_v8, %s433_s21  ;;  %v391_v9 = vpop.f32.mrb[1].mxu0 }
  0xf2   : > { %v252_v10 = vpop.f32.mrb[2].mxu0 }
  0xf3   : > { %v392_v11 = vpop.f32.mrb[3].mxu0 }
  0xf5   : > { %290 = vrot.lane.b32.xlu1 %v249_v8, %s434_s22  ;;  %286 = vrot.lane.b32.xlu0 %v249_v8, %s435_s23 }
  0xf9   : > { %267 = vrot.lane.b32.xlu1 %v249_v8, %s436_s24  ;;  %262 = vrot.lane.b32.xlu0 %v249_v8, %s437_s25 }
  0xfd   : > { %272 = vrot.lane.b32.xlu1 %v249_v8, %s438_s28  ;;  %301 = vperm.xlu0 %414, %v171_v12  }
 0x101   : > { %276 = vrot.lane.b32.xlu0 %v249_v8, %s439_s29  ;;  %306 = vperm.xlu1 %415, %v171_v12  }
 0x102   : > { %416 = vset.pattern.permute.xlu0 %v431_v7 }
 0x163   : > { %v283_v13 = vpop.permute.xlu0 %282  ;;  %v257_v16 = vpop.permute.xlu1 %256 }
 0x164   : > { %v285_v18 = vmax.f32 %v249_v8, %v283_v13  ;;  %v260_v24 = vsel %vm259_vm3, -inf, %v257_v16 }
 0x165   : > { %v261_v27 = vsel %vm480_vm4, %v260_v24, -inf }
 0x167   : > { %v287_v17 = vpop.permute.xlu0 %286  ;;  %v291_v21 = vpop.permute.xlu1 %290 }
 0x168   : > { %v289_v20 = vmax.f32 %v285_v18, %v287_v17 }
 0x16a   : > { %v293_v25 = vmax.f32 %v289_v20, %v291_v21 }
 0x16b   : > { %v263_v22 = vpop.permute.xlu0 %262  ;;  %v268_v28 = vpop.permute.xlu1 %267 }
 0x16c   : > { %v265_v26 = vsel %vm259_vm3, -inf, %v263_v22  ;;  %v294_v29 = vmax.f32 %v293_v25, %v261_v27  ;;  %v271_v33 = vsel %vm270_vm5, -inf, %v268_v28 }
 0x16d   : > { %v266_v30 = vsel %vm480_vm4, %v265_v26, -inf }
 0x16e   : > { %v295_v31 = vmax.f32 %v294_v29, %v266_v30 }
 0x16f   : > { %v273_v32 = vpop.permute.xlu1 %272 }
 0x170   : > { %v296_v35 = vmax.f32 %v295_v31, %v271_v33  ;;  %v275_v36 = vsel %vm270_vm5, -inf, %v273_v32 }
 0x172   : > { %v297_v38 = vmax.f32 %v296_v35, %v275_v36 }
 0x17c   : > { %v302_v34 = vpop.permute.xlu0 %301 }
 0x180   : > { %v277_v37 = vpop.permute.xlu0 %276  ;;  %v307_v42 = vpop.permute.xlu1 %306 }
 0x181   : > { %v280_v39 = vsel %vm279_vm6, -inf, %v277_v37 }
 0x182   : > { %v281_v40 = vsel %vm480_vm4, %v280_v39, -inf }
 0x183   : > { %v298_v41 = vmax.f32 %v297_v38, %v281_v40 }
 0x185   : > { %v304_v43 = vmul.f32 %v302_v34, %v298_v41 }
 0x187   : > { %v309_v44 = vadd.f32 %v307_v42, %v304_v43 }
 0x189   : > { %v310_v45 = vmax.f32 %v309_v44, 0.0 }
 0x18b   : > { %312 = vst.msk [vmem:[%s168_s6] sm:$0xff] %vm311_vm7, %v310_v45 }
 0x18c PF: > { %s13_s12 = sadd.s32 1, %s426_s12  }
 0x18d   : > { %p10_p4 = scmp.ge.s32.totalorder %s13_s12, 4  }
 0x18f   :  { %12 = sbr.rel (!%p10_p4) target bundleno = 1 (0x1), region = 62 }

</bundles_post_ra>
